<compile_context>
chip_gen: v7x
topology: tpu7x:2x2x1
jax: 0.10.0
libtpu: 0.0.40
codegen_flags: <defaults>
</compile_context>

<pallas_src>
import functools

import jax
import jax.numpy as jnp
from jax.experimental import pallas as pl
from jax.experimental.pallas import tpu as pltpu

# Small config consistent with the module (intermediate_size = 4 * hidden_size)
BATCH = 2
SEQ = 8
HIDDEN = 32            # config.hidden_size
INTERMEDIATE = 128     # config.intermediate_size
LN_EPS = 1e-12         # config.layer_norm_eps
LANE = 128
HP = ((HIDDEN + LANE - 1) // LANE) * LANE   # lane-dense hidden width (=128)


def _output_kernel(x_ref, res_ref, wp_ref, out_ref, res_pad_ref,
                   *, i_size, h_true, eps):
    """Single-step kernel.

    x:       (R, I)      rows = batch*seq, I = intermediate_size (lane-dense)
    res:     (R, H)      residual (input_tensor), un-padded
    wp:      (I+3, HP)   packed params: rows [0:I] = W^T, row I = bias,
                         row I+1 = gamma, row I+2 = beta (columns >= H are 0)
    out:     (R, HP)     lane-dense output (columns >= H are exactly 0)
    res_pad: (R, HP)     VMEM scratch for the zero-padded residual
    """
    # Stage the residual into a zero-padded, lane-dense buffer (masked store
    # of a tiny (R, H) tile; hidden under the MXU work).
    res_pad_ref[...] = jnp.zeros_like(res_pad_ref)
    res_pad_ref[:, 0:h_true] = res_ref[...]

    x = x_ref[...]
    w = wp_ref[0:i_size, :]                       # (I, HP)
    b = wp_ref[i_size:i_size + 1, :]              # (1, HP)
    gamma = wp_ref[i_size + 1:i_size + 2, :]      # (1, HP)
    beta = wp_ref[i_size + 2:i_size + 3, :]       # (1, HP)

    # dense(hidden_states) + bias + residual. Dropout is identity in eval mode.
    y = (jnp.dot(x, w, preferred_element_type=jnp.float32)
         + b + res_pad_ref[...])

    # LayerNorm over the true hidden columns. Padded columns of y are exactly
    # zero (w, b, residual zero-padded), so full-width sums only see the true
    # H columns; divisor is the true H.
    inv_h = 1.0 / h_true
    mean = jnp.sum(y, axis=-1, keepdims=True) * inv_h
    var = jnp.sum(y * y, axis=-1, keepdims=True) * inv_h - mean * mean
    var = jnp.maximum(var, 0.0)                   # guard E[x^2]-E[x]^2 cancellation
    y_norm = (y - mean) * jax.lax.rsqrt(var + eps)

    # gamma/beta padded columns are zero -> padded output columns are zero.
    out_ref[...] = (y_norm * gamma + beta).astype(out_ref.dtype)


@jax.jit
def elasticbert_output(hidden_states, input_tensor, param_slab):
    """hidden_states: [B, S, I], input_tensor: [B, S, H] -> [B, S, H].

    param_slab: pre-packed, pre-padded (I+3, HP) parameter slab (see
    make_params) — padding is done once at load time, not per call.
    """
    B, S, I = hidden_states.shape
    H = input_tensor.shape[-1]
    hp = param_slab.shape[-1]
    R = B * S

    x = hidden_states.reshape(R, I)
    res = input_tensor.reshape(R, H)

    kernel = functools.partial(_output_kernel, i_size=I, h_true=H, eps=LN_EPS)
    out = pl.pallas_call(
        kernel,
        out_shape=jax.ShapeDtypeStruct((R, hp), hidden_states.dtype),
        scratch_shapes=[pltpu.VMEM((R, hp), jnp.float32)],
        cost_estimate=pl.CostEstimate(
            flops=2 * R * I * hp,
            transcendentals=0,
            bytes_accessed=4 * (R * I + R * H + (I + 3) * hp + R * hp),
        ),
    )(x, res, param_slab)

    # Consumer here is plain JAX, so slice back to the true hidden width.
    # A downstream Pallas layer should instead consume the padded (R, HP)
    # layout directly and avoid this slice + re-pad at the next boundary.
    return out[:, :H].reshape(B, S, H)


def make_params(key):
    """Deterministic synthetic parameters.

    Returns:
      slab: (I+3, HP) f32 packed+padded parameter slab for the kernel
            (rows [0:I] = W^T, row I = bias, row I+1 = gamma, row I+2 = beta;
            columns >= HIDDEN are zero — required for the padded-LayerNorm
            trick inside the kernel).
      raw:  dict of un-padded parameters for the pure-JAX reference.
    """
    ks = jax.random.split(key, 4)
    std = 0.02
    w = jax.random.normal(ks[0], (INTERMEDIATE, HIDDEN), jnp.float32) * std
    b = jax.random.normal(ks[1], (HIDDEN,), jnp.float32) * std
    gamma = 1.0 + 0.1 * jax.random.normal(ks[2], (HIDDEN,), jnp.float32)
    beta = 0.1 * jax.random.normal(ks[3], (HIDDEN,), jnp.float32)

    slab = jnp.zeros((INTERMEDIATE + 3, HP), jnp.float32)
    slab = slab.at[:INTERMEDIATE, :HIDDEN].set(w)
    slab = slab.at[INTERMEDIATE, :HIDDEN].set(b)
    slab = slab.at[INTERMEDIATE + 1, :HIDDEN].set(gamma)
    slab = slab.at[INTERMEDIATE + 2, :HIDDEN].set(beta)

    raw = {"w": w, "b": b, "gamma": gamma, "beta": beta}
    return slab, raw


def reference(hidden_states, input_tensor, raw):
    """Pure-JAX reference of ElasticBertOutput.forward (eval mode)."""
    y = jnp.einsum("bsi,ih->bsh", hidden_states, raw["w"]) + raw["b"]
    y = y + input_tensor                      # dropout is identity in eval
    mean = jnp.mean(y, axis=-1, keepdims=True)
    var = jnp.mean((y - mean) ** 2, axis=-1, keepdims=True)
    return (y - mean) / jnp.sqrt(var + LN_EPS) * raw["gamma"] + raw["beta"]


if __name__ == "__main__":
    key = jax.random.PRNGKey(0)
    k_x, k_r, k_p = jax.random.split(key, 3)

    hidden_states = jax.random.normal(k_x, (BATCH, SEQ, INTERMEDIATE), jnp.float32)
    input_tensor = jax.random.normal(k_r, (BATCH, SEQ, HIDDEN), jnp.float32)
    param_slab, raw_params = make_params(k_p)

    out = elasticbert_output(hidden_states, input_tensor, param_slab)
    out = jax.block_until_ready(out)

    assert out.shape == (BATCH, SEQ, HIDDEN)
    assert bool(jnp.all(jnp.isfinite(out)))

    ref = reference(hidden_states, input_tensor, raw_params)
    max_err = float(jnp.max(jnp.abs(out - ref)))
    assert max_err < 1e-3, f"mismatch vs reference: max abs err = {max_err}"

    print("KERNEL_OK")
</pallas_src>

<mosaic_0001>
module attributes {stable_mosaic.version = 11 : i64} {
  func.func @_output_kernel(%arg0: memref<16x128xf32, #tpu.memory_space<vmem>>, %arg1: memref<16x32xf32, #tpu.memory_space<vmem>>, %arg2: memref<131x128xf32, #tpu.memory_space<vmem>>, %arg3: memref<16x128xf32, #tpu.memory_space<vmem>>, %arg4: memref<16x128xf32, #tpu.memory_space<vmem>>) attributes {dimension_semantics = [], scalar_prefetch = 0 : i64, scratch_operands = 1 : i64, tpu.core_type = #tpu.core_type<tc>} {
    %cst = arith.constant 0.000000e+00 : f32
    %0 = vector.broadcast %cst : f32 to vector<16x128xf32>
    %c0 = arith.constant 0 : index
    %c0_0 = arith.constant 0 : index
    %1 = vector.load %arg4[%c0, %c0_0] : memref<16x128xf32, #tpu.memory_space<vmem>>, vector<16x128xf32>
    tpu.vector_store %arg4[%c0, %c0_0], %0 {strides = array<i32>} : memref<16x128xf32, #tpu.memory_space<vmem>>, vector<16x128xf32>,
    %c0_1 = arith.constant 0 : index
    %c0_2 = arith.constant 0 : index
    %2 = vector.load %arg1[%c0_1, %c0_2] : memref<16x32xf32, #tpu.memory_space<vmem>>, vector<16x32xf32>
    %c0_3 = arith.constant 0 : index
    %c0_4 = arith.constant 0 : index
    %3 = vector.load %arg4[%c0_3, %c0_4] : memref<16x128xf32, #tpu.memory_space<vmem>>, vector<16x32xf32>
    tpu.vector_store %arg4[%c0_3, %c0_4], %2 {strides = array<i32>} : memref<16x128xf32, #tpu.memory_space<vmem>>, vector<16x32xf32>,
    %c0_5 = arith.constant 0 : index
    %c0_6 = arith.constant 0 : index
    %4 = vector.load %arg0[%c0_5, %c0_6] : memref<16x128xf32, #tpu.memory_space<vmem>>, vector<16x128xf32>
    %c0_7 = arith.constant 0 : index
    %c0_8 = arith.constant 0 : index
    %5 = vector.load %arg2[%c0_7, %c0_8] : memref<131x128xf32, #tpu.memory_space<vmem>>, vector<128x128xf32>
    %c128 = arith.constant 128 : index
    %c0_9 = arith.constant 0 : index
    %6 = vector.load %arg2[%c128, %c0_9] : memref<131x128xf32, #tpu.memory_space<vmem>>, vector<1x128xf32>
    %c129 = arith.constant 129 : index
    %c0_10 = arith.constant 0 : index
    %7 = vector.load %arg2[%c129, %c0_10] : memref<131x128xf32, #tpu.memory_space<vmem>>, vector<1x128xf32>
    %c130 = arith.constant 130 : index
    %c0_11 = arith.constant 0 : index
    %8 = vector.load %arg2[%c130, %c0_11] : memref<131x128xf32, #tpu.memory_space<vmem>>, vector<1x128xf32>
    %cst_12 = arith.constant dense<0.000000e+00> : vector<16x128xf32>
    %9 = tpu.matmul %4, %5, %cst_12 {dimension_numbers = #tpu.dot_dimension_numbers<[1], [0], [0], [1], [0, 0, 1, 1], [], []>} : vector<16x128xf32>, vector<128x128xf32>, vector<16x128xf32> -> vector<16x128xf32>
    %10 = vector.broadcast %6 : vector<1x128xf32> to vector<16x128xf32>
    %11 = arith.addf %9, %10 : vector<16x128xf32>
    %c0_13 = arith.constant 0 : index
    %c0_14 = arith.constant 0 : index
    %12 = vector.load %arg4[%c0_13, %c0_14] : memref<16x128xf32, #tpu.memory_space<vmem>>, vector<16x128xf32>
    %13 = arith.addf %11, %12 : vector<16x128xf32>
    %cst_15 = arith.constant dense<0.000000e+00> : vector<16xf32>
    %14 = vector.multi_reduction <add>, %13, %cst_15 [1] : vector<16x128xf32> to vector<16xf32>
    %15 = vector.shape_cast %14 : vector<16xf32> to vector<16x1xf32>
    %cst_16 = arith.constant 3.125000e-02 : f32
    %16 = vector.broadcast %cst_16 : f32 to vector<16x1xf32>
    %17 = arith.mulf %15, %16 : vector<16x1xf32>
    %18 = arith.mulf %13, %13 : vector<16x128xf32>
    %cst_17 = arith.constant dense<0.000000e+00> : vector<16xf32>
    %19 = vector.multi_reduction <add>, %18, %cst_17 [1] : vector<16x128xf32> to vector<16xf32>
    %20 = vector.shape_cast %19 : vector<16xf32> to vector<16x1xf32>
    %cst_18 = arith.constant 3.125000e-02 : f32
    %21 = vector.broadcast %cst_18 : f32 to vector<16x1xf32>
    %22 = arith.mulf %20, %21 : vector<16x1xf32>
    %23 = arith.mulf %17, %17 : vector<16x1xf32>
    %24 = arith.subf %22, %23 : vector<16x1xf32>
    %cst_19 = arith.constant 0.000000e+00 : f32
    %25 = vector.broadcast %cst_19 : f32 to vector<16x1xf32>
    %26 = arith.maximumf %24, %25 : vector<16x1xf32>
    %27 = vector.broadcast %17 : vector<16x1xf32> to vector<16x128xf32>
    %28 = arith.subf %13, %27 : vector<16x128xf32>
    %cst_20 = arith.constant 9.99999996E-13 : f32
    %29 = vector.broadcast %cst_20 : f32 to vector<16x1xf32>
    %30 = arith.addf %26, %29 : vector<16x1xf32>
    %31 = math.rsqrt %30 : vector<16x1xf32>
    %32 = vector.broadcast %31 : vector<16x1xf32> to vector<16x128xf32>
    %33 = arith.mulf %28, %32 : vector<16x128xf32>
    %34 = vector.broadcast %7 : vector<1x128xf32> to vector<16x128xf32>
    %35 = arith.mulf %33, %34 : vector<16x128xf32>
    %36 = vector.broadcast %8 : vector<1x128xf32> to vector<16x128xf32>
    %37 = arith.addf %35, %36 : vector<16x128xf32>
    %c0_21 = arith.constant 0 : index
    %c0_22 = arith.constant 0 : index
    %38 = vector.load %arg3[%c0_21, %c0_22] : memref<16x128xf32, #tpu.memory_space<vmem>>, vector<16x128xf32>
    tpu.vector_store %arg3[%c0_21, %c0_22], %37 {strides = array<i32>} : memref<16x128xf32, #tpu.memory_space<vmem>>, vector<16x128xf32>,
    return
  }
}

</mosaic_0001>

<bundles_post_ra>
// kernel: elasticbert_output.1
= control target key start
LH: loop header
LB: loop body
LE: loop exit
PB: predicated region body
PF: predicated region fallthrough
CT: control target
= control target key end

     0   :  { %8 = vsyncpa [#allocation4], 0  ;;  %s468_s0 = inlined_call_operand.hbm [shape: f32[16,128], index: 0, kind: input, shape index: {}]   ;;  %s469_s1 = inlined_call_operand.hbm [shape: f32[16,32], index: 1, kind: input, shape index: {}]   ;;  %s470_s2 = inlined_call_operand.hbm [shape: f32[131,128], index: 2, kind: input, shape index: {}]   ;;  %s471_s3 = inlined_call_operand.vmem [shape: f32[16,128], index: 3, kind: output, shape index: {}]  }
   0x1   :  { %9 = vsyncpa [#allocation6], 0  ;;  %s382_s12 = smov [#allocation5]   ;;  %s383_s14 = smov [#allocation3]  }
   0x2   :  { %s27_s13 = sshll.u32 %s382_s12, 4  ;;  %s15_s15 = sshll.u32 %s383_s14, 4  ;;  %s28_s13 = int_to_ptr.vmem [resolvable:$true] %s27_s13  ;;  %s408_s15 = int_to_ptr.vmem [resolvable:$true] %s15_s15 }
   0x3   :  { %s312_s18 = scalar_lea.hbm %s469_s1, 256 }
   0x4   :  { %p313_p0 = scmp.ne.s32.totalorder %s469_s1, %s312_s18  ;;  %p316_p1 = scmp.lt.u32.totalorder %s312_s18, %s469_s1 }
   0x6   :  { %p318_p2 = pnand %p316_p1, %p313_p0 }
   0x8   :  { %321 = shalt.err (!%p318_p2)
}
   0x9   :  { %s322_s23 = scalar_lea.vmem %s28_s13, 256  ;;  %p327_p4 = scmp.lt.s32.totalorder %s28_s13, %s28_s13 }
   0xa   :  { %p323_p3 = scmp.ne.s32.totalorder %s28_s13, %s322_s23  ;;  %p328_p5 = scmp.lt.s32.totalorder %s322_s23, %s322_s23 }
   0xc   :  { %p329_p6 = por %p328_p5, %p327_p4 }
   0xe   :  { %p330_p7 = pnand %p329_p6, %p323_p3 }
  0x10   :  { %333 = shalt.err (!%p330_p7)
}
  0x11   :  { %s384_s24 = smov 128   ;;  %s385_s25 = smov 8  }
  0x12   :  { %33 = dma.hbm_to_vmem [thread:$0]  %s469_s1, 256, %s28_s13, [#allocation6], %s384_s24, %s384_s24, %s385_s25  }
  0x13   :  { %s334_s30 = scalar_lea.hbm %s468_s0, 256 }
  0x14   :  { %p335_p8 = scmp.ne.s32.totalorder %s468_s0, %s334_s30  ;;  %p338_p9 = scmp.lt.u32.totalorder %s334_s30, %s468_s0 }
  0x16   :  { %p340_p10 = pnand %p338_p9, %p335_p8 }
  0x18   :  { %343 = shalt.err (!%p340_p10)
}
  0x19   :  { %s344_s8 = scalar_lea.vmem %s408_s15, 256  ;;  %p349_p12 = scmp.lt.s32.totalorder %s408_s15, %s408_s15 }
  0x1a   :  { %p345_p11 = scmp.ne.s32.totalorder %s408_s15, %s344_s8  ;;  %p350_p13 = scmp.lt.s32.totalorder %s344_s8, %s344_s8 }
  0x1c   :  { %p351_p0 = por %p350_p13, %p349_p12 }
  0x1e   :  { %p352_p1 = pnand %p351_p0, %p345_p11 }
  0x20   :  { %355 = shalt.err (!%p352_p1)
}
  0x21   :  { %21 = dma.hbm_to_vmem [thread:$0]  %s468_s0, 256, %s408_s15, [#allocation4], %s384_s24, %s384_s24, %s385_s25  }
  0x22   :  { %s386_s10 = smov [#allocation7]   ;;  %s356_s14 = scalar_lea.hbm %s470_s2, 2176 }
  0x23   :  { %s39_s11 = sshll.u32 %s386_s10, 4  ;;  %p357_p2 = scmp.ne.s32.totalorder %s470_s2, %s356_s14  ;;  %s40_s11 = int_to_ptr.vmem [resolvable:$true] %s39_s11 }
  0x24   :  { %p360_p3 = scmp.lt.u32.totalorder %s356_s14, %s470_s2 }
  0x26   :  { %p362_p4 = pnand %p360_p3, %p357_p2 }
  0x28   :  { %365 = shalt.err (!%p362_p4)
}
  0x29   :  { %s366_s20 = scalar_lea.vmem %s40_s11, 2176  ;;  %p371_p6 = scmp.lt.s32.totalorder %s40_s11, %s40_s11 }
  0x2a   :  { %p367_p5 = scmp.ne.s32.totalorder %s40_s11, %s366_s20  ;;  %p372_p7 = scmp.lt.s32.totalorder %s366_s20, %s366_s20 }
  0x2c   :  { %p373_p8 = por %p372_p7, %p371_p6 }
  0x2e   :  { %p374_p9 = pnand %p373_p8, %p367_p5 }
  0x30   :  { %377 = shalt.err (!%p374_p9)
}
  0x31   :  { %45 = dma.hbm_to_vmem [thread:$0]  %s470_s2, 2176, %s40_s11, [#allocation6], %s384_s24, %s384_s24, %s385_s25  }
  0x32   :  { %378 = dma.done.wait [#allocation4], 256  }
  0x33   :  { %379 = vsyncadd [#allocation4], 4294967040 }
  0x34   :  { %380 = dma.done.wait [#allocation6], 2432  }
  0x35   :  { %381 = vsyncadd [#allocation6], 4294964864  ;;  %v387_v0 = vmov 0.0   ;;  %v64_v1 = vld [vmem:[#allocation7] sm:$0xff]  ;;  %v65_v2 = vld [vmem:[#allocation7 + $0x8] sm:$0xff]  ;;  %vm59_vm0 = vcmask 261120  }
  0x36   :  { %56 = vst [vmem:[#allocation2 + $0x8] sm:$0xff] %v387_v0  ;;  %55 = vst [vmem:[#allocation2] sm:$0xff] %v387_v0  ;;  %v66_v3 = vld [vmem:[#allocation7 + $0x10] sm:$0xff]  ;;  %v270_v4 = vpack.c.bf16 %v65_v2, %v64_v1  ;;  %v67_v5 = vld [vmem:[#allocation7 + $0x18] sm:$0xff] }
  0x37   :  { %v274_v6 = vpack.c.bf16 %v67_v5, %v66_v3  ;;  %v68_v7 = vld [vmem:[#allocation7 + $0x20] sm:$0xff]  ;;  %v69_v8 = vld [vmem:[#allocation7 + $0x28] sm:$0xff]  ;;  %v70_v11 = vld [vmem:[#allocation7 + $0x30] sm:$0xff] }
  0x38   :  { %271 = vmatprep.subr.bf16.mxu0 %v270_v4  ;;  %v278_v9 = vpack.c.bf16 %v69_v8, %v68_v7  ;;  %v62_v10 = vld [vmem:[#allocation3] sm:$0xff]  ;;  %v71_v12 = vld [vmem:[#allocation7 + $0x38] sm:$0xff]  ;;  %v73_v16 = vld [vmem:[#allocation7 + $0x48] sm:$0xff] }
  0x39   :  { %273 = vmatpush3.bf16.msra.mxu0 %v270_v4  ;;  %267 = vmatprep.mubr.f32.mxu0 %v62_v10  ;;  %v58_v13 = vld [vmem:[#allocation5 + $0x8] sm:$0xff]  ;;  %v282_v14 = vpack.c.bf16 %v71_v12, %v70_v11  ;;  %v72_v15 = vld [vmem:[#allocation7 + $0x40] sm:$0xff]  ;;  %v74_v18 = vld [vmem:[#allocation7 + $0x50] sm:$0xff] }
  0x3a   :  { %275 = vmatprep.subr.bf16.mxu0 %v274_v6  ;;  %61 = vst.msk [vmem:[#allocation2 + $0x8] sm:$0xff] %vm59_vm0, %v58_v13  ;;  %v286_v17 = vpack.c.bf16 %v73_v16, %v72_v15  ;;  %v75_v19 = vld [vmem:[#allocation7 + $0x58] sm:$0xff]  ;;  %v76_v21 = vld [vmem:[#allocation7 + $0x60] sm:$0xff]  ;;  %v77_v22 = vld [vmem:[#allocation7 + $0x68] sm:$0xff] }
  0x3b   :  { %v290_v20 = vpack.c.bf16 %v75_v19, %v74_v18  ;;  %v294_v23 = vpack.c.bf16 %v77_v22, %v76_v21  ;;  %v78_v24 = vld [vmem:[#allocation7 + $0x70] sm:$0xff]  ;;  %v79_v25 = vld [vmem:[#allocation7 + $0x78] sm:$0xff]  ;;  %v63_v27 = vld [vmem:[#allocation3 + $0x8] sm:$0xff] }
  0x3c   :  { %v298_v26 = vpack.c.bf16 %v79_v25, %v78_v24  ;;  %v57_v28 = vld [vmem:[#allocation5] sm:$0xff]  ;;  %v214_v29 = vld [vmem:[#allocation7 + $0x80] ss:$0 sm:$0xff]  ;;  %v215_v58 = vld [vmem:[#allocation7 + $0x81] ss:$0 sm:$0xff] }
  0x3d   :  { %277 = vmatpush3.bf16.msra.mxu0 %v274_v6  ;;  %60 = vst.msk [vmem:[#allocation2] sm:$0xff] %vm59_vm0, %v57_v28  ;;  %v216_v60 = vld [vmem:[#allocation7 + $0x82] ss:$0 sm:$0xff] }
  0x3e   :  { %279 = vmatprep.subr.bf16.mxu0 %v278_v9 }
  0x41   :  { %281 = vmatpush3.bf16.msra.mxu0 %v278_v9  ;;  %v163_v35 = vld [vmem:[#allocation2 + $0x8] sm:$0xff] }
  0x42   :  { %283 = vmatprep.subr.bf16.mxu0 %v282_v14 }
  0x44   :  { %v162_v32 = vld [vmem:[#allocation2] sm:$0xff] }
  0x45   :  { %285 = vmatpush3.bf16.msra.mxu0 %v282_v14 }
  0x46   :  { %287 = vmatprep.subr.bf16.mxu0 %v286_v17 }
  0x49   :  { %289 = vmatpush3.bf16.msra.mxu0 %v286_v17 }
  0x4a   :  { %291 = vmatprep.subr.bf16.mxu0 %v290_v20 }
  0x4d   :  { %293 = vmatpush3.bf16.msra.mxu0 %v290_v20 }
  0x4e   :  { %295 = vmatprep.subr.bf16.mxu0 %v294_v23 }
  0x51   :  { %297 = vmatpush3.bf16.msra.mxu0 %v294_v23 }
  0x52   :  { %299 = vmatprep.subr.bf16.mxu0 %v298_v26 }
  0x55   :  { %301 = vmatpush3.bf16.msra.mxu0 %v298_v26 }
  0x58   :  { %268 = vmatmul.mubr.f32.vlgmr.msra.gmra.mrb[0].mxu0 %v63_v27 }
 0x12b   :  { %v269_v30 = vpop.f32.mrb[0].mxu0 }
 0x12c   :  { %v153_v31 = vpop.f32.mrb[1].mxu0  ;;  %v159_v33 = vadd.f32 %v269_v30, %v214_v29 }
 0x12d   :  { %v154_v34 = vadd.f32 %v214_v29, %v153_v31 }
 0x12e   :  { %v165_v37 = vadd.f32 %v163_v35, %v159_v33 }
 0x12f   :  { %v164_v36 = vadd.f32 %v162_v32, %v154_v34 }
 0x130   :  { %v173_v39 = vmul.f32 %v165_v37, %v165_v37 }
 0x131   :  { %166 = vadd.xlane.f32.xlu0 %v164_v36  ;;  %v172_v38 = vmul.f32 %v164_v36, %v164_v36 }
 0x133   :  { %174 = vadd.xlane.f32.xlu1 %v172_v38 }
 0x135   :  { %168 = vadd.xlane.f32.xlu0 %v165_v37 }
 0x137   :  { %176 = vadd.xlane.f32.xlu1 %v173_v39 }
 0x1be   :  { %v167_v40 = vpop.xlane.xlu0 %166 }
 0x1bf   :  { %v170_v41 = vmul.f32 0.03125, %v167_v40 }
 0x1c0   :  { %v175_v42 = vpop.xlane.xlu1 %174 }
 0x1c1   :  { %v180_v43 = vmul.f32 %v170_v41, %v170_v41  ;;  %v178_v44 = vmul.f32 0.03125, %v175_v42  ;;  %v186_v56 = vsub.f32 %v164_v36, %v170_v41 }
 0x1c2   :  { %v169_v45 = vpop.xlane.xlu0 %168 }
 0x1c3   :  { %v182_v46 = vsub.f32 %v178_v44, %v180_v43  ;;  %v171_v47 = vmul.f32 0.03125, %v169_v45 }
 0x1c4   :  { %v177_v48 = vpop.xlane.xlu1 %176 }
 0x1c5   :  { %v184_v49 = vmax.f32 %v182_v46, 0.0  ;;  %v181_v50 = vmul.f32 %v171_v47, %v171_v47  ;;  %v179_v51 = vmul.f32 0.03125, %v177_v48  ;;  %v187_v62 = vsub.f32 %v165_v37, %v171_v47 }
 0x1c7   :  { %v188_v52 = vadd.f32 1e-12, %v184_v49  ;;  %v183_v53 = vsub.f32 %v179_v51, %v181_v50 }
 0x1c9   :  { %308 = vrsqrt.f32 %v188_v52  ;;  %v185_v54 = vmax.f32 %v183_v53, 0.0 }
 0x1cb   :  { %v189_v55 = vadd.f32 1e-12, %v185_v54 }
 0x1cd   :  { %310 = vrsqrt.f32 %v189_v55 }
 0x1d3   :  { %v309_v57 = vpop.eup %308 }
 0x1d4   :  { %v192_v59 = vmul.f32 %v309_v57, %v186_v56 }
 0x1d6   :  { %v198_v61 = vmul.f32 %v215_v58, %v192_v59 }
 0x1d7   :  { %v311_v63 = vpop.eup %310 }
 0x1d8   :  { %v204_v0 = vadd.f32 %v216_v60, %v198_v61  ;;  %v193_v1 = vmul.f32 %v311_v63, %v187_v62 }
 0x1da   :  { %206 = vst [vmem:[%s471_s3] sm:$0xff] %v204_v0  ;;  %v199_v2 = vmul.f32 %v215_v58, %v193_v1 }
 0x1dc   :  { %v205_v3 = vadd.f32 %v216_v60, %v199_v2 }
 0x1de   :  { %207 = vst [vmem:[%s471_s3 + $0x8] sm:$0xff] %v205_v3 }
 0x1df   :  { %212 = vsyncpa [#allocation4], 1 }
 0x1e0   :  { %213 = vsyncpa [#allocation6], 1 }

</bundles_post_ra>
